<compile_context>
chip_gen: v7x
topology: tpu7x:2x2x1
jax: 0.10.0
libtpu: 0.0.40
codegen_flags: <defaults>
</compile_context>

<pallas_src>
import jax
import jax.numpy as jnp
from jax.experimental import pallas as pl
from jax.experimental.pallas import tpu as pltpu


# ----------------------------------------------------------------------------
# Fused Pallas kernel: ts-embedding + residual MLP stack + per-node head
# ----------------------------------------------------------------------------
def _fused_predictor_kernel(
    x_ts_ref, emb_ref, ts_w_ref, ts_b_ref,
    mw1_ref, mb1_ref, mw2_ref, mb2_ref,
    hw1_ref, hb1_ref, hw2_ref, hb2_ref,
    out_ref,
):
    """One node-tile of the forward pass; activation stays in registers/VMEM.

    Rows are node-major (row = n * B + b) so per-node head weights act on
    contiguous (B, F) row groups.  All MXU dots use bf16 operands with f32
    accumulation; the residual stream is kept in f32.
    """
    cdt = ts_w_ref.dtype                       # compute dtype for MXU operands
    L = mw1_ref.shape[0]
    F = mw1_ref.shape[1]
    Gn, B, _ = out_ref.shape                   # nodes in this tile, batch, out_dim

    # --- STID time-series embedding (1x1 conv == dense over T*Cin) ---
    ts = jnp.dot(x_ts_ref[...].astype(cdt), ts_w_ref[...],
                 preferred_element_type=jnp.float32) + ts_b_ref[...]

    # hidden = [ts_emb | node_emb | tod_emb | dow_emb], built in registers
    # (no VMEM scratch, no masked column stores).
    h = jnp.concatenate([ts, emb_ref[...]], axis=-1)            # (Gn*B, F) f32

    # --- residual MLP encoder layers (L small & static -> unrolled at trace) ---
    for l in range(L):
        z = jnp.maximum(
            jnp.dot(h.astype(cdt), mw1_ref[l],
                    preferred_element_type=jnp.float32) + mb1_ref[l], 0.0)
        h = h + jnp.dot(z.astype(cdt), mw2_ref[l],
                        preferred_element_type=jnp.float32) + mb2_ref[l]

    # --- per-node head, batched over the node group (single store per tile) ---
    h3 = h.reshape(Gn, B, F)                                     # node-major groups
    hn = jnp.tanh(
        jnp.einsum("gbf,gfk->gbk", h3.astype(cdt), hw1_ref[...],
                   preferred_element_type=jnp.float32) + hb1_ref[...])
    out = jnp.einsum("gbf,gfo->gbo", hn.astype(cdt), hw2_ref[...],
                     preferred_element_type=jnp.float32) + hb2_ref[...]
    out_ref[...] = out.astype(out_ref.dtype)


def _choose_nodes_per_tile(N, B, target_rows=512):
    """Largest divisor of N whose row count is sublane-aligned and <= target."""
    cands = [g for g in range(1, N + 1)
             if N % g == 0 and (g * B) % 8 == 0 and g * B <= target_rows]
    return max(cands) if cands else N


def _nbytes(shape, dtype):
    n = 1
    for s in shape:
        n *= s
    return n * jnp.dtype(dtype).itemsize


def fused_predictor(x_ts, emb, ts_w, ts_b, mw1, mb1, mw2, mb2,
                    hw1, hb1, hw2, hb2, *, nodes_per_tile=None):
    """Single pallas_call for the whole predictor hot path.

    x_ts : (N*B, T*Cin)  node-major rows (row = n*B + b)
    emb  : (N*B, 3*H)    [node | tod | dow] identity embeddings, node-major rows
    returns (N, B, out_dim).
    """
    M, TC = x_ts.shape
    H = ts_w.shape[1]
    L, F, _ = mw1.shape
    N = hw1.shape[0]
    out_dim = hw2.shape[2]
    B = M // N
    assert N * B == M, (N, B, M)

    Gn = nodes_per_tile if nodes_per_tile is not None else _choose_nodes_per_tile(N, B)
    assert N % Gn == 0 and ((Gn * B) % 8 == 0 or Gn == N), (N, B, Gn)
    num_tiles = N // Gn
    GnB = Gn * B

    # Biases reshaped so they broadcast directly against the kernel tiles.
    ts_b = ts_b.reshape(1, H)
    mb1 = mb1.reshape(L, 1, F)
    mb2 = mb2.reshape(L, 1, F)
    hb1 = hb1.reshape(N, 1, F)
    hb2 = hb2.reshape(N, 1, out_dim)

    # Explicit scoped-VMEM budget from the tile sizes (covers double buffering
    # with generous margin; never below the common 32 MiB default).
    block_bytes = (
        _nbytes((GnB, TC), x_ts.dtype) + _nbytes((GnB, 3 * H), emb.dtype)
        + _nbytes((TC, H), ts_w.dtype) + _nbytes((1, H), ts_b.dtype)
        + _nbytes((L, F, F), mw1.dtype) + _nbytes((L, 1, F), mb1.dtype)
        + _nbytes((L, F, F), mw2.dtype) + _nbytes((L, 1, F), mb2.dtype)
        + _nbytes((Gn, F, F), hw1.dtype) + _nbytes((Gn, 1, F), hb1.dtype)
        + _nbytes((Gn, F, out_dim), hw2.dtype) + _nbytes((Gn, 1, out_dim), hb2.dtype)
        + _nbytes((Gn, B, out_dim), jnp.float32))
    vmem_limit = int(max(32 * 1024 * 1024, 4 * block_bytes + (4 << 20)))

    return pl.pallas_call(
        _fused_predictor_kernel,
        out_shape=jax.ShapeDtypeStruct((N, B, out_dim), jnp.float32),
        grid=(num_tiles,),
        in_specs=[
            pl.BlockSpec((GnB, TC), lambda g: (g, 0)),           # x_ts   (node tile)
            pl.BlockSpec((GnB, 3 * H), lambda g: (g, 0)),        # emb    (node tile)
            pl.BlockSpec((TC, H), lambda g: (0, 0)),             # ts_w   (resident)
            pl.BlockSpec((1, H), lambda g: (0, 0)),              # ts_b   (resident)
            pl.BlockSpec((L, F, F), lambda g: (0, 0, 0)),        # mlp w1 (resident)
            pl.BlockSpec((L, 1, F), lambda g: (0, 0, 0)),        # mlp b1 (resident)
            pl.BlockSpec((L, F, F), lambda g: (0, 0, 0)),        # mlp w2 (resident)
            pl.BlockSpec((L, 1, F), lambda g: (0, 0, 0)),        # mlp b2 (resident)
            pl.BlockSpec((Gn, F, F), lambda g: (g, 0, 0)),       # head w1 (node tile)
            pl.BlockSpec((Gn, 1, F), lambda g: (g, 0, 0)),       # head b1
            pl.BlockSpec((Gn, F, out_dim), lambda g: (g, 0, 0)), # head w2
            pl.BlockSpec((Gn, 1, out_dim), lambda g: (g, 0, 0)), # head b2
        ],
        out_specs=pl.BlockSpec((Gn, B, out_dim), lambda g: (g, 0, 0)),
        compiler_params=pltpu.CompilerParams(
            dimension_semantics=("parallel",),      # disjoint node tiles -> megacore OK
            vmem_limit_bytes=vmem_limit),
    )(x_ts, emb, ts_w, ts_b, mw1, mb1, mw2, mb2, hw1, hb1, hw2, hb2)


# ----------------------------------------------------------------------------
# Predictor forward (tiny gathers / layout prep in plain JAX, hot path in Pallas)
# ----------------------------------------------------------------------------
def predictor_forward(params, history_data, *, nodes_per_tile=None,
                      compute_dtype=jnp.bfloat16):
    B, T, N, _ = history_data.shape
    Cin = params["input_dim"]
    H = params["hid_dim"]

    # time-series input, node-major rows: (N*B, T*Cin)
    # TODO(synk): fold this transpose into the BlockSpec index_map once the
    # natural (B,T,N,Cin) layout has a lane-friendly last dim (Cin=1 here).
    x = history_data[..., :Cin]                                   # (B, T, N, Cin)
    x_ts = jnp.transpose(x, (2, 0, 1, 3)).reshape(N * B, T * Cin)

    # identity embeddings (tiny data-dependent gathers kept in plain JAX)
    tod = params["time_of_day_size"]
    dow = params["day_of_week_size"]
    tid_idx = jnp.clip((history_data[:, -1, :, 1] * tod).astype(jnp.int32), 0, tod - 1)
    diw_idx = jnp.clip((history_data[:, -1, :, 2] * dow).astype(jnp.int32), 0, dow - 1)
    tid_emb = params["tid_emb"][tid_idx]                          # (B, N, H)
    diw_emb = params["diw_emb"][diw_idx]                          # (B, N, H)
    node_emb = jnp.broadcast_to(params["node_emb"][None], (B, N, H))
    # channel order mirrors STID: [time_series, node, time_of_day, day_of_week]
    emb = jnp.concatenate([node_emb, tid_emb, diw_emb], axis=-1)  # (B, N, 3H)
    emb = jnp.transpose(emb, (1, 0, 2)).reshape(N * B, 3 * H)     # node-major rows

    cdt = compute_dtype
    out = fused_predictor(
        x_ts, emb,
        params["ts_w"].astype(cdt), params["ts_b"],
        params["mlp_w1"].astype(cdt), params["mlp_b1"],
        params["mlp_w2"].astype(cdt), params["mlp_b2"],
        params["w1"].astype(cdt), params["b1"],
        params["w2"].astype(cdt), params["b2"],
        nodes_per_tile=nodes_per_tile,
    )                                                             # (N, B, out_dim)
    return jnp.transpose(out, (1, 0, 2))                          # (B, N, out_dim)


# Pure-jnp f32 reference for correctness checking.
def reference_forward(params, history_data):
    B, T, N, _ = history_data.shape
    Cin = params["input_dim"]
    H = params["hid_dim"]
    x = history_data[..., :Cin]
    x = jnp.transpose(x, (0, 2, 1, 3)).reshape(B, N, T * Cin)
    ts_emb = x @ params["ts_w"] + params["ts_b"]
    tod = params["time_of_day_size"]
    dow = params["day_of_week_size"]
    tid_idx = jnp.clip((history_data[:, -1, :, 1] * tod).astype(jnp.int32), 0, tod - 1)
    diw_idx = jnp.clip((history_data[:, -1, :, 2] * dow).astype(jnp.int32), 0, dow - 1)
    tid_emb = params["tid_emb"][tid_idx]
    diw_emb = params["diw_emb"][diw_idx]
    node_emb = jnp.broadcast_to(params["node_emb"][None], (B, N, H))
    hidden = jnp.concatenate([ts_emb, node_emb, tid_emb, diw_emb], axis=-1)
    for l in range(params["mlp_w1"].shape[0]):
        hidden = hidden + jnp.maximum(
            hidden @ params["mlp_w1"][l] + params["mlp_b1"][l], 0.0
        ) @ params["mlp_w2"][l] + params["mlp_b2"][l]
    enc = jnp.transpose(hidden, (1, 0, 2))                        # (N, B, 4H)
    h = jnp.tanh(jnp.einsum("nbf,nfg->nbg", enc, params["w1"]) + params["b1"][:, None, :])
    out = jnp.einsum("nbf,nfo->nbo", h, params["w2"]) + params["b2"][:, None, :]
    return jnp.transpose(out, (1, 0, 2))


# ----------------------------------------------------------------------------
# Main
# ----------------------------------------------------------------------------
if __name__ == "__main__":
    # small shapes
    B, T, N = 2, 12, 8
    input_dim, hid_dim, out_dim, num_layers = 1, 8, 4, 2
    time_of_day_size, day_of_week_size = 288, 7
    F = 4 * hid_dim

    key = jax.random.PRNGKey(0)
    ks = iter(jax.random.split(key, 32))

    def u(shape):
        return jax.random.uniform(next(ks), shape, dtype=jnp.float32)

    params = {
        "input_dim": input_dim,
        "hid_dim": hid_dim,
        "time_of_day_size": time_of_day_size,
        "day_of_week_size": day_of_week_size,
        # STID encoder params (reconstructed; encoder source not in the provided snippet)
        "ts_w": (u((T * input_dim, hid_dim)) - 0.5) * 0.2,
        "ts_b": (u((hid_dim,)) - 0.5) * 0.2,
        "node_emb": u((N, hid_dim)),
        "tid_emb": u((time_of_day_size, hid_dim)),
        "diw_emb": u((day_of_week_size, hid_dim)),
        # residual-MLP layer weights, stacked as (L, F, F) / (L, F)
        "mlp_w1": (u((num_layers, F, F)) - 0.5) * 0.2,
        "mlp_b1": (u((num_layers, F)) - 0.5) * 0.2,
        "mlp_w2": (u((num_layers, F, F)) - 0.5) * 0.2,
        "mlp_b2": (u((num_layers, F)) - 0.5) * 0.2,
        # Predictor head params (torch.rand init -> uniform [0,1))
        "w1": u((N, F, F)),
        "b1": u((N, F)),
        "w2": u((N, F, out_dim)),
        "b2": u((N, out_dim)),
    }

    # history_data: (B, T, N, 3); feature 0 = value, 1 = time-of-day fraction,
    # 2 = day-of-week fraction (both in [0, 1)).
    kx, kt, kd = jax.random.split(next(ks), 3)
    values = jax.random.normal(kx, (B, T, N, 1), dtype=jnp.float32)
    tod_f = jax.random.uniform(kt, (B, T, N, 1), dtype=jnp.float32, maxval=0.999)
    dow_f = jax.random.uniform(kd, (B, T, N, 1), dtype=jnp.float32, maxval=0.999)
    history_data = jnp.concatenate([values, tod_f, dow_f], axis=-1)

    # nodes_per_tile=4 -> grid=(2,) exercises the tiled/parallel path at demo shapes.
    out = jax.block_until_ready(
        predictor_forward(params, history_data, nodes_per_tile=4))
    ref = jax.block_until_ready(reference_forward(params, history_data))

    assert out.shape == (B, N, out_dim), out.shape
    # bf16 MXU operands with f32 accumulation vs. f32 reference -> loose-ish tolerance.
    assert jnp.allclose(out, ref, rtol=3e-2, atol=3e-2), float(jnp.max(jnp.abs(out - ref)))

    # TODO(synk): STIDEncoder source was not provided; dropout is eval-mode identity and
    # the identity-embedding gathers are done in plain JAX (tiny, data-dependent).
    print("KERNEL_OK")
</pallas_src>

<mosaic_0001>
module attributes {stable_mosaic.version = 11 : i64} {
  func.func @_fused_predictor_kernel(%arg0: i32, %arg1: memref<8x12xf32, #tpu.memory_space<vmem>>, %arg2: memref<8x24xf32, #tpu.memory_space<vmem>>, %arg3: memref<12x8xbf16, #tpu.memory_space<vmem>>, %arg4: memref<1x8xf32, #tpu.memory_space<vmem>>, %arg5: memref<2x32x32xbf16, #tpu.memory_space<vmem>>, %arg6: memref<2x1x32xf32, #tpu.memory_space<vmem>>, %arg7: memref<2x32x32xbf16, #tpu.memory_space<vmem>>, %arg8: memref<2x1x32xf32, #tpu.memory_space<vmem>>, %arg9: memref<4x32x32xbf16, #tpu.memory_space<vmem>>, %arg10: memref<4x1x32xf32, #tpu.memory_space<vmem>>, %arg11: memref<4x32x4xbf16, #tpu.memory_space<vmem>>, %arg12: memref<4x1x4xf32, #tpu.memory_space<vmem>>, %arg13: memref<4x2x4xf32, #tpu.memory_space<vmem>>) attributes {dimension_semantics = [#tpu.dimension_semantics<parallel>], iteration_bounds = array<i64: 2>, scalar_prefetch = 0 : i64, scratch_operands = 0 : i64, tpu.core_type = #tpu.core_type<tc>, window_params = [{transform_indices = @transform_0, window_bounds = array<i64: 8, 12>}, {transform_indices = @transform_1, window_bounds = array<i64: 8, 24>}, {pipeline_mode = #tpu.pipeline_mode<synchronous>, transform_indices = @transform_2, window_bounds = array<i64: 12, 8>}, {pipeline_mode = #tpu.pipeline_mode<synchronous>, transform_indices = @transform_3, window_bounds = array<i64: 1, 8>}, {pipeline_mode = #tpu.pipeline_mode<synchronous>, transform_indices = @transform_4, window_bounds = array<i64: 2, 32, 32>}, {pipeline_mode = #tpu.pipeline_mode<synchronous>, transform_indices = @transform_5, window_bounds = array<i64: 2, 1, 32>}, {pipeline_mode = #tpu.pipeline_mode<synchronous>, transform_indices = @transform_6, window_bounds = array<i64: 2, 32, 32>}, {pipeline_mode = #tpu.pipeline_mode<synchronous>, transform_indices = @transform_7, window_bounds = array<i64: 2, 1, 32>}, {transform_indices = @transform_8, window_bounds = array<i64: 4, 32, 32>}, {transform_indices = @transform_9, window_bounds = array<i64: 4, 1, 32>}, {transform_indices = @transform_10, window_bounds = array<i64: 4, 32, 4>}, {transform_indices = @transform_11, window_bounds = array<i64: 4, 1, 4>}, {transform_indices = @transform_12, window_bounds = array<i64: 4, 2, 4>}]} {
    %c0 = arith.constant 0 : index
    %c0_0 = arith.constant 0 : index
    %0 = vector.load %arg1[%c0, %c0_0] : memref<8x12xf32, #tpu.memory_space<vmem>>, vector<8x12xf32>
    %1 = arith.truncf %0 : vector<8x12xf32> to vector<8x12xbf16>
    %c0_1 = arith.constant 0 : index
    %c0_2 = arith.constant 0 : index
    %2 = vector.load %arg3[%c0_1, %c0_2] : memref<12x8xbf16, #tpu.memory_space<vmem>>, vector<12x8xbf16>
    %cst = arith.constant dense<0.000000e+00> : vector<8x8xf32>
    %3 = tpu.matmul %1, %2, %cst {dimension_numbers = #tpu.dot_dimension_numbers<[1], [0], [0], [1], [0, 0, 1, 1], [], []>} : vector<8x12xbf16>, vector<12x8xbf16>, vector<8x8xf32> -> vector<8x8xf32>
    %c0_3 = arith.constant 0 : index
    %c0_4 = arith.constant 0 : index
    %4 = vector.load %arg4[%c0_3, %c0_4] : memref<1x8xf32, #tpu.memory_space<vmem>>, vector<1x8xf32>
    %5 = vector.broadcast %4 : vector<1x8xf32> to vector<8x8xf32>
    %6 = arith.addf %3, %5 : vector<8x8xf32>
    %c0_5 = arith.constant 0 : index
    %c0_6 = arith.constant 0 : index
    %7 = vector.load %arg2[%c0_5, %c0_6] : memref<8x24xf32, #tpu.memory_space<vmem>>, vector<8x24xf32>
    %8 = tpu.concatenate %6, %7 in 1 : vector<8x8xf32>, vector<8x24xf32> -> vector<8x32xf32>
    %9 = arith.truncf %8 : vector<8x32xf32> to vector<8x32xbf16>
    %c0_7 = arith.constant 0 : index
    %c0_8 = arith.constant 0 : index
    %c0_9 = arith.constant 0 : index
    %10 = vector.load %arg5[%c0_7, %c0_8, %c0_9] : memref<2x32x32xbf16, #tpu.memory_space<vmem>>, vector<1x32x32xbf16>
    %11 = vector.shape_cast %10 : vector<1x32x32xbf16> to vector<32x32xbf16>
    %cst_10 = arith.constant dense<0.000000e+00> : vector<8x32xf32>
    %12 = tpu.matmul %9, %11, %cst_10 {dimension_numbers = #tpu.dot_dimension_numbers<[1], [0], [0], [1], [0, 0, 1, 1], [], []>} : vector<8x32xbf16>, vector<32x32xbf16>, vector<8x32xf32> -> vector<8x32xf32>
    %c0_11 = arith.constant 0 : index
    %c0_12 = arith.constant 0 : index
    %c0_13 = arith.constant 0 : index
    %13 = vector.load %arg6[%c0_11, %c0_12, %c0_13] : memref<2x1x32xf32, #tpu.memory_space<vmem>>, vector<1x1x32xf32>
    %14 = vector.shape_cast %13 : vector<1x1x32xf32> to vector<1x32xf32>
    %15 = vector.broadcast %14 : vector<1x32xf32> to vector<8x32xf32>
    %16 = arith.addf %12, %15 : vector<8x32xf32>
    %cst_14 = arith.constant 0.000000e+00 : f32
    %17 = vector.broadcast %cst_14 : f32 to vector<8x32xf32>
    %18 = arith.maximumf %16, %17 : vector<8x32xf32>
    %19 = arith.truncf %18 : vector<8x32xf32> to vector<8x32xbf16>
    %c0_15 = arith.constant 0 : index
    %c0_16 = arith.constant 0 : index
    %c0_17 = arith.constant 0 : index
    %20 = vector.load %arg7[%c0_15, %c0_16, %c0_17] : memref<2x32x32xbf16, #tpu.memory_space<vmem>>, vector<1x32x32xbf16>
    %21 = vector.shape_cast %20 : vector<1x32x32xbf16> to vector<32x32xbf16>
    %cst_18 = arith.constant dense<0.000000e+00> : vector<8x32xf32>
    %22 = tpu.matmul %19, %21, %cst_18 {dimension_numbers = #tpu.dot_dimension_numbers<[1], [0], [0], [1], [0, 0, 1, 1], [], []>} : vector<8x32xbf16>, vector<32x32xbf16>, vector<8x32xf32> -> vector<8x32xf32>
    %23 = arith.addf %8, %22 : vector<8x32xf32>
    %c0_19 = arith.constant 0 : index
    %c0_20 = arith.constant 0 : index
    %c0_21 = arith.constant 0 : index
    %24 = vector.load %arg8[%c0_19, %c0_20, %c0_21] : memref<2x1x32xf32, #tpu.memory_space<vmem>>, vector<1x1x32xf32>
    %25 = vector.shape_cast %24 : vector<1x1x32xf32> to vector<1x32xf32>
    %26 = vector.broadcast %25 : vector<1x32xf32> to vector<8x32xf32>
    %27 = arith.addf %23, %26 : vector<8x32xf32>
    %28 = arith.truncf %27 : vector<8x32xf32> to vector<8x32xbf16>
    %c1 = arith.constant 1 : index
    %c0_22 = arith.constant 0 : index
    %c0_23 = arith.constant 0 : index
    %29 = vector.load %arg5[%c1, %c0_22, %c0_23] : memref<2x32x32xbf16, #tpu.memory_space<vmem>>, vector<1x32x32xbf16>
    %30 = vector.shape_cast %29 : vector<1x32x32xbf16> to vector<32x32xbf16>
    %cst_24 = arith.constant dense<0.000000e+00> : vector<8x32xf32>
    %31 = tpu.matmul %28, %30, %cst_24 {dimension_numbers = #tpu.dot_dimension_numbers<[1], [0], [0], [1], [0, 0, 1, 1], [], []>} : vector<8x32xbf16>, vector<32x32xbf16>, vector<8x32xf32> -> vector<8x32xf32>
    %c1_25 = arith.constant 1 : index
    %c0_26 = arith.constant 0 : index
    %c0_27 = arith.constant 0 : index
    %32 = vector.load %arg6[%c1_25, %c0_26, %c0_27] : memref<2x1x32xf32, #tpu.memory_space<vmem>>, vector<1x1x32xf32>
    %33 = vector.shape_cast %32 : vector<1x1x32xf32> to vector<1x32xf32>
    %34 = vector.broadcast %33 : vector<1x32xf32> to vector<8x32xf32>
    %35 = arith.addf %31, %34 : vector<8x32xf32>
    %cst_28 = arith.constant 0.000000e+00 : f32
    %36 = vector.broadcast %cst_28 : f32 to vector<8x32xf32>
    %37 = arith.maximumf %35, %36 : vector<8x32xf32>
    %38 = arith.truncf %37 : vector<8x32xf32> to vector<8x32xbf16>
    %c1_29 = arith.constant 1 : index
    %c0_30 = arith.constant 0 : index
    %c0_31 = arith.constant 0 : index
    %39 = vector.load %arg7[%c1_29, %c0_30, %c0_31] : memref<2x32x32xbf16, #tpu.memory_space<vmem>>, vector<1x32x32xbf16>
    %40 = vector.shape_cast %39 : vector<1x32x32xbf16> to vector<32x32xbf16>
    %cst_32 = arith.constant dense<0.000000e+00> : vector<8x32xf32>
    %41 = tpu.matmul %38, %40, %cst_32 {dimension_numbers = #tpu.dot_dimension_numbers<[1], [0], [0], [1], [0, 0, 1, 1], [], []>} : vector<8x32xbf16>, vector<32x32xbf16>, vector<8x32xf32> -> vector<8x32xf32>
    %42 = arith.addf %27, %41 : vector<8x32xf32>
    %c1_33 = arith.constant 1 : index
    %c0_34 = arith.constant 0 : index
    %c0_35 = arith.constant 0 : index
    %43 = vector.load %arg8[%c1_33, %c0_34, %c0_35] : memref<2x1x32xf32, #tpu.memory_space<vmem>>, vector<1x1x32xf32>
    %44 = vector.shape_cast %43 : vector<1x1x32xf32> to vector<1x32xf32>
    %45 = vector.broadcast %44 : vector<1x32xf32> to vector<8x32xf32>
    %46 = arith.addf %42, %45 : vector<8x32xf32>
    %47 = vector.shape_cast %46 : vector<8x32xf32> to vector<4x2x32xf32>
    %48 = arith.truncf %47 : vector<4x2x32xf32> to vector<4x2x32xbf16>
    %c0_36 = arith.constant 0 : index
    %c0_37 = arith.constant 0 : index
    %c0_38 = arith.constant 0 : index
    %49 = vector.load %arg9[%c0_36, %c0_37, %c0_38] : memref<4x32x32xbf16, #tpu.memory_space<vmem>>, vector<4x32x32xbf16>
    "tpu.trace_start"() <{level = 10 : i32, message = "gbf,gfk->gbk"}> : () -> ()
    %cst_39 = arith.constant dense<0.000000e+00> : vector<4x2x32xf32>
    %50 = tpu.matmul %48, %49, %cst_39 {dimension_numbers = #tpu.dot_dimension_numbers<[2], [1], [1], [2], [0, 0, 0, 1, 1, 2], [0], [0]>} : vector<4x2x32xbf16>, vector<4x32x32xbf16>, vector<4x2x32xf32> -> vector<4x2x32xf32>
    "tpu.trace_stop"() : () -> ()
    %c0_40 = arith.constant 0 : index
    %c0_41 = arith.constant 0 : index
    %c0_42 = arith.constant 0 : index
    %51 = vector.load %arg10[%c0_40, %c0_41, %c0_42] : memref<4x1x32xf32, #tpu.memory_space<vmem>>, vector<4x1x32xf32>
    %52 = vector.broadcast %51 : vector<4x1x32xf32> to vector<4x2x32xf32>
    %53 = arith.addf %50, %52 : vector<4x2x32xf32>
    %54 = math.tanh %53 : vector<4x2x32xf32>
    %55 = arith.truncf %54 : vector<4x2x32xf32> to vector<4x2x32xbf16>
    %c0_43 = arith.constant 0 : index
    %c0_44 = arith.constant 0 : index
    %c0_45 = arith.constant 0 : index
    %56 = vector.load %arg11[%c0_43, %c0_44, %c0_45] : memref<4x32x4xbf16, #tpu.memory_space<vmem>>, vector<4x32x4xbf16>
    "tpu.trace_start"() <{level = 10 : i32, message = "gbf,gfo->gbo"}> : () -> ()
    %cst_46 = arith.constant dense<0.000000e+00> : vector<4x2x4xf32>
    %57 = tpu.matmul %55, %56, %cst_46 {dimension_numbers = #tpu.dot_dimension_numbers<[2], [1], [1], [2], [0, 0, 0, 1, 1, 2], [0], [0]>} : vector<4x2x32xbf16>, vector<4x32x4xbf16>, vector<4x2x4xf32> -> vector<4x2x4xf32>
    "tpu.trace_stop"() : () -> ()
    %c0_47 = arith.constant 0 : index
    %c0_48 = arith.constant 0 : index
    %c0_49 = arith.constant 0 : index
    %58 = vector.load %arg12[%c0_47, %c0_48, %c0_49] : memref<4x1x4xf32, #tpu.memory_space<vmem>>, vector<4x1x4xf32>
    %59 = vector.broadcast %58 : vector<4x1x4xf32> to vector<4x2x4xf32>
    %60 = arith.addf %57, %59 : vector<4x2x4xf32>
    %c0_50 = arith.constant 0 : index
    %c0_51 = arith.constant 0 : index
    %c0_52 = arith.constant 0 : index
    %61 = vector.load %arg13[%c0_50, %c0_51, %c0_52] : memref<4x2x4xf32, #tpu.memory_space<vmem>>, vector<4x2x4xf32>
    tpu.vector_store %arg13[%c0_50, %c0_51, %c0_52], %60 {strides = array<i32>} : memref<4x2x4xf32, #tpu.memory_space<vmem>>, vector<4x2x4xf32>,
    return
  }
  func.func @transform_0(%arg0: i32) -> (i32, i32) {
    %c0_i32 = arith.constant 0 : i32
    %c0_i32_0 = arith.constant 0 : i32
    return %arg0, %c0_i32 : i32, i32
  }
  func.func @transform_1(%arg0: i32) -> (i32, i32) {
    %c0_i32 = arith.constant 0 : i32
    %c0_i32_0 = arith.constant 0 : i32
    return %arg0, %c0_i32 : i32, i32
  }
  func.func @transform_2(%arg0: i32) -> (i32, i32) {
    %c0_i32 = arith.constant 0 : i32
    %c0_i32_0 = arith.constant 0 : i32
    %c0_i32_1 = arith.constant 0 : i32
    return %c0_i32, %c0_i32_0 : i32, i32
  }
  func.func @transform_3(%arg0: i32) -> (i32, i32) {
    %c0_i32 = arith.constant 0 : i32
    %c0_i32_0 = arith.constant 0 : i32
    %c0_i32_1 = arith.constant 0 : i32
    return %c0_i32, %c0_i32_0 : i32, i32
  }
  func.func @transform_4(%arg0: i32) -> (i32, i32, i32) {
    %c0_i32 = arith.constant 0 : i32
    %c0_i32_0 = arith.constant 0 : i32
    %c0_i32_1 = arith.constant 0 : i32
    %c0_i32_2 = arith.constant 0 : i32
    return %c0_i32, %c0_i32_0, %c0_i32_1 : i32, i32, i32
  }
  func.func @transform_5(%arg0: i32) -> (i32, i32, i32) {
    %c0_i32 = arith.constant 0 : i32
    %c0_i32_0 = arith.constant 0 : i32
    %c0_i32_1 = arith.constant 0 : i32
    %c0_i32_2 = arith.constant 0 : i32
    return %c0_i32, %c0_i32_0, %c0_i32_1 : i32, i32, i32
  }
  func.func @transform_6(%arg0: i32) -> (i32, i32, i32) {
    %c0_i32 = arith.constant 0 : i32
    %c0_i32_0 = arith.constant 0 : i32
    %c0_i32_1 = arith.constant 0 : i32
    %c0_i32_2 = arith.constant 0 : i32
    return %c0_i32, %c0_i32_0, %c0_i32_1 : i32, i32, i32
  }
  func.func @transform_7(%arg0: i32) -> (i32, i32, i32) {
    %c0_i32 = arith.constant 0 : i32
    %c0_i32_0 = arith.constant 0 : i32
    %c0_i32_1 = arith.constant 0 : i32
    %c0_i32_2 = arith.constant 0 : i32
    return %c0_i32, %c0_i32_0, %c0_i32_1 : i32, i32, i32
  }
  func.func @transform_8(%arg0: i32) -> (i32, i32, i32) {
    %c0_i32 = arith.constant 0 : i32
    %c0_i32_0 = arith.constant 0 : i32
    %c0_i32_1 = arith.constant 0 : i32
    return %arg0, %c0_i32, %c0_i32_0 : i32, i32, i32
  }
  func.func @transform_9(%arg0: i32) -> (i32, i32, i32) {
    %c0_i32 = arith.constant 0 : i32
    %c0_i32_0 = arith.constant 0 : i32
    %c0_i32_1 = arith.constant 0 : i32
    return %arg0, %c0_i32, %c0_i32_0 : i32, i32, i32
  }
  func.func @transform_10(%arg0: i32) -> (i32, i32, i32) {
    %c0_i32 = arith.constant 0 : i32
    %c0_i32_0 = arith.constant 0 : i32
    %c0_i32_1 = arith.constant 0 : i32
    return %arg0, %c0_i32, %c0_i32_0 : i32, i32, i32
  }
  func.func @transform_11(%arg0: i32) -> (i32, i32, i32) {
    %c0_i32 = arith.constant 0 : i32
    %c0_i32_0 = arith.constant 0 : i32
    %c0_i32_1 = arith.constant 0 : i32
    return %arg0, %c0_i32, %c0_i32_0 : i32, i32, i32
  }
  func.func @transform_12(%arg0: i32) -> (i32, i32, i32) {
    %c0_i32 = arith.constant 0 : i32
    %c0_i32_0 = arith.constant 0 : i32
    %c0_i32_1 = arith.constant 0 : i32
    return %arg0, %c0_i32, %c0_i32_0 : i32, i32, i32
  }
}

</mosaic_0001>

<bundles_post_ra>
// kernel: tpu_custom_call.1
= control target key start
LH: loop header
LB: loop body
LE: loop exit
PB: predicated region body
PF: predicated region fallthrough
CT: control target
= control target key end

     0   :  { %s2574_s0 = inlined_call_operand.hbm [shape: f32[16,12], index: 0, kind: input, shape index: {}]   ;;  %s2575_s1 = inlined_call_operand.hbm [shape: f32[16,24], index: 1, kind: input, shape index: {}]   ;;  %s2576_s2 = inlined_call_operand.vmem [shape: bf16[12,8], index: 2, kind: input, shape index: {}]   ;;  %s2577_s3 = inlined_call_operand.vmem [shape: f32[1,8], index: 3, kind: input, shape index: {}]   ;;  %s2578_s4 = inlined_call_operand.vmem [shape: bf16[2,32,32], index: 4, kind: input, shape index: {}]   ;;  %s2579_s5 = inlined_call_operand.hbm [shape: f32[2,1,32], index: 5, kind: input, shape index: {}]   ;;  %s2580_s6 = inlined_call_operand.vmem [shape: bf16[2,32,32], index: 6, kind: input, shape index: {}]   ;;  %s2581_s7 = inlined_call_operand.hbm [shape: f32[2,1,32], index: 7, kind: input, shape index: {}]   ;;  %s2582_s8 = inlined_call_operand.vmem [shape: bf16[8,32,32], index: 8, kind: input, shape index: {}]   ;;  %s2583_s9 = inlined_call_operand.vmem [shape: f32[8,1,32], index: 9, kind: input, shape index: {}]   ;;  %s2584_s10 = inlined_call_operand.vmem [shape: bf16[8,32,4], index: 10, kind: input, shape index: {}]   ;;  %s2585_s11 = inlined_call_operand.vmem [shape: f32[8,1,4], index: 11, kind: input, shape index: {}]   ;;  %s2586_s12 = inlined_call_operand.vmem [shape: f32[8,2,4], index: 12, kind: output, shape index: {}]  }
   0x1   :  { %2591 = sst [smem:[#allocation15_spill]] %s2579_s5 }
   0x2   :  { %2592 = sst [smem:[#allocation16_spill]] %s2581_s7 }
   0x3   :  { %2593 = sst [smem:[#allocation17_spill]] %s2585_s11 }
   0x4   :  { %2594 = sst [smem:[#allocation18_spill]] %s2586_s12 }
   0x5   :  { %17 = vsyncpa [#allocation3], 0 }
   0x6   :  { %19 = vsyncpa [#allocation3 + $0x1], 0 }
   0x7   :  { %20 = vsyncpa [#allocation5], 0 }
   0x8   :  { %22 = vsyncpa [#allocation5 + $0x1], 0 }
   0x9   :  { %23 = vsyncpa [#allocation8], 0  ;;  %s2226_s21 = smov 0   ;;  %s2228_s22 = smov 0  }
   0xa   :  { %s2230_s23 = smov 0   ;;  %s2232_s24 = smov 0  }
   0xb LB: > { %2595 = sst [smem:[#allocation13_spill]] %s2145_s23  ;;  %s2245_s25 = sadd.s32 4294967295, %s2149_s24   ;;  %s2149_s24 = sphi %s2232_s24, %s2615_s24   ;;  %s2145_s23 = sphi %s2230_s23, %s2612_s23   ;;  %s2141_s22 = sphi %s2228_s22, %s2614_s22   ;;  %s2137_s21 = sphi %s2226_s21, %s2613_s21  }
   0xc   : > { %p49_p0 = scmp.ne.s32.totalorder %s2141_s22, %s2137_s21  ;;  %p2587_p1 = scmp.eq.s32.totalorder %s2245_s25, 0 }
   0xd   : > { %p1657_p2 = scmp.ge.s32.totalorder %s2149_s24, 1  ;;  %p342_p3 = scmp.lt.s32.totalorder %s2149_s24, 3 }
   0xe   : > { %p2253_p4 = por %p2587_p1, %p49_p0  ;;  %s2151_s28 = smov [#allocation6]  }
   0xf   : > { %p2257_p5 = pnand %p1657_p2, %p342_p3  ;;  %s363_s29 = sshll.u32 %s2151_s28, 4  ;;  %s364_s29 = int_to_ptr.vmem [resolvable:$true] %s363_s29 }
  0x10   : > { %s2596_s26 = scalar_select %p2253_p4, 1, 0 }
  0x11   : > { %s2597_s27 = scalar_select %p2257_p5, 1, 0 }
  0x12   : > { %p1895_p6 = pneg %p2257_p5  ;;  %s2152_s13 = smov [#allocation7]  }
  0x13   : > { %s379_s14 = sshll.u32 %s2152_s13, 4  ;;  %s2599_s5 = sld [smem:[#allocation15_spill]]  ;;  %s2269_s14 = int_to_ptr.vmem [resolvable:$true] %s379_s14 }
  0x14   : > { %p2265_p7 = pnand %p1895_p6, %p2587_p1 }
  0x16   : > { %p1989_p9 = pneg %p2265_p7 }
  0x19   : > { %s1987_s17 = scalar_lea.hbm %s2599_s5, 32 }
  0x1a   : > { %p1988_p8 = scmp.ne.s32.totalorder %s2599_s5, %s1987_s17  ;;  %p1994_p12 = scmp.lt.u32.totalorder %s1987_s17, %s2599_s5 }
  0x1c   : > { %p1990_p10 = pnand %p1989_p9, %p1988_p8 }
  0x1e   : > { %p1991_p11 = pneg %p1990_p10 }
  0x20   : > { %p1996_p13 = pnand %p1994_p12, %p1991_p11 }
  0x22   : > { %1999 = shalt.err (!%p1996_p13)
}
  0x23   : > { %s2000_s28 = scalar_lea.vmem %s364_s29, 32  ;;  %p2008_p6 = scmp.lt.s32.totalorder %s364_s29, %s364_s29 }
  0x24   : > { %p2001_p0 = scmp.ne.s32.totalorder %s364_s29, %s2000_s28  ;;  %p2009_p1 = scmp.lt.s32.totalorder %s2000_s28, %s2000_s28 }
  0x26   : > { %p2003_p2 = pnand %p2001_p0, %p1989_p9  ;;  %p2010_p4 = por %p2009_p1, %p2008_p6 }
  0x28   : > { %p2004_p3 = pneg %p2003_p2 }
  0x2a   : > { %p2011_p5 = pnand %p2010_p4, %p2004_p3 }
  0x2c   : > { %2014 = shalt.err (!%p2011_p5)
}
  0x2d   : > { %s2153_s13 = smov 16   ;;  %s2154_s15 = smov 1  }
  0x2e   : > { %1898 = dma.hbm_to_vmem [thread:$0]  (!%p2265_p7), %s2599_s5, 32, %s364_s29, [#allocation5], %s2153_s13, %s2153_s13, %s2154_s15  }
  0x2f   : > { %s2600_s7 = sld [smem:[#allocation16_spill]] }
  0x35   : > { %s2015_s20 = scalar_lea.hbm %s2600_s7, 32 }
  0x36   : > { %p2016_p8 = scmp.ne.s32.totalorder %s2600_s7, %s2015_s20  ;;  %p2022_p5 = scmp.lt.u32.totalorder %s2015_s20, %s2600_s7 }
  0x38   : > { %p2018_p1 = pnand %p2016_p8, %p1989_p9 }
  0x3a   : > { %p2019_p4 = pneg %p2018_p1 }
  0x3c   : > { %p2024_p10 = pnand %p2022_p5, %p2019_p4 }
  0x3e   : > { %2027 = shalt.err (!%p2024_p10)
}
  0x3f   : > { %s2028_s29 = scalar_lea.vmem %s2269_s14, 32  ;;  %p2036_p0 = scmp.lt.s32.totalorder %s2269_s14, %s2269_s14 }
  0x40   : > { %p2029_p11 = scmp.ne.s32.totalorder %s2269_s14, %s2028_s29  ;;  %p2037_p2 = scmp.lt.s32.totalorder %s2028_s29, %s2028_s29 }
  0x42   : > { %p2031_p12 = pnand %p2029_p11, %p1989_p9  ;;  %p2038_p3 = por %p2037_p2, %p2036_p0 }
  0x44   : > { %p2032_p13 = pneg %p2031_p12 }
  0x46   : > { %p2039_p6 = pnand %p2038_p3, %p2032_p13 }
  0x48   : > { %2042 = shalt.err (!%p2039_p6)
}
  0x49   : > { %1901 = dma.hbm_to_vmem [thread:$0]  (!%p2265_p7), %s2600_s7, 32, %s2269_s14, [#allocation8], %s2153_s13, %s2153_s13, %s2154_s15  }
  0x4a   : > { %s2319_s16 = sadd.s32 1, %s2149_s24   ;;  %s36_s17 = sadd.s32 1, %s2145_s23 }
  0x4b   : > { %s33_s30 = ssub.s32 %s2149_s24, %s2319_s16  ;;  %p43_p9 = scmp.ne.s32.totalorder %s2145_s23, %s2141_s22 }
  0x4c   : > { %p34_p8 = scmp.eq.s32.totalorder %s33_s30, 0  ;;  %p44_p1 = scmp.eq.s32.totalorder %s2149_s24, 0 }
  0x4d   : > { %p1911_p4 = scmp.lt.s32.totalorder %s2149_s24, 2  ;;  %s393_s18 = sand.u32 1, %s2145_s23  }
  0x4e   : > { %s2330_s19 = scalar_select %p34_p8, %s2145_s23, %s36_s17  }
  0x4f   : > { %p45_p5 = por %p44_p1, %p43_p9  ;;  %s2332_s20 = sshll.u32 %s393_s18, 3 }
  0x50   : > { %2601 = sst [smem:[#allocation14_spill]] %s2330_s19  ;;  %s1662_s21 = sshll.u32 %s2149_s24, 7 }
  0x51   : > { %s2338_s14 = scalar_lea.hbm %s2574_s0, %s1662_s21  ;;  %s397_s13 = scalar_lea.vmem [#allocation2], %s2332_s20 }
  0x52   : > { %s404_s15 = sshll.u32 %s397_s13, 4  ;;  %p2341_p7 = pnand %p1911_p4, %p45_p5  ;;  %s2345_s15 = int_to_ptr.vmem [resolvable:$true] %s404_s15 }
  0x53   : > { %s2350_s30 = scalar_lea.hbm %s2575_s1, %s1662_s21  ;;  %s394_s28 = scalar_lea.sflag [#allocation3], %s393_s18 }
  0x54   : > { %s2043_s29 = scalar_lea.hbm %s2338_s14, 128  ;;  %p2045_p11 = pneg %p2341_p7 }
  0x55   : > { %p2044_p10 = scmp.ne.s32.totalorder %s2338_s14, %s2043_s29  ;;  %s2048_s7 = scalar_lea.hbm %s2574_s0, 256 }
  0x56   : > { %p2049_p0 = scmp.lt.u32.totalorder %s2338_s14, %s2574_s0  ;;  %p2050_p2 = scmp.lt.u32.totalorder %s2048_s7, %s2043_s29 }
  0x57   : > { %p2046_p12 = pnand %p2045_p11, %p2044_p10  ;;  %p2052_p6 = scmp.lt.u32.totalorder %s2043_s29, %s2338_s14 }
  0x58   : > { %p2051_p3 = por %p2050_p2, %p2049_p0 }
  0x59   : > { %p2047_p13 = pneg %p2046_p12 }
  0x5a   : > { %p2053_p9 = por %p2052_p6, %p2051_p3 }
  0x5c   : > { %p2054_p8 = pnand %p2053_p9, %p2047_p13 }
  0x5e   : > { %2057 = shalt.err (!%p2054_p8)
}
  0x5f   : > { %s2058_s18 = scalar_lea.vmem %s2345_s15, 128  ;;  %s2155_s5 = smov [#allocation2]  }
  0x60   : > { %p2059_p1 = scmp.ne.s32.totalorder %s2345_s15, %s2058_s18  ;;  %s2063_s21 = sshll.u32 %s2155_s5, 4  ;;  %s2064_s21 = int_to_ptr.vmem [resolvable:$false] %s2063_s21 }
  0x61   : > { %s2065_s23 = scalar_lea.vmem %s2064_s21, 256  ;;  %p2066_p10 = scmp.lt.s32.totalorder %s2345_s15, %s2064_s21 }
  0x62   : > { %p2061_p4 = pnand %p2059_p1, %p2045_p11  ;;  %p2067_p12 = scmp.lt.s32.totalorder %s2065_s23, %s2058_s18 }
  0x64   : > { %p2062_p5 = pneg %p2061_p4  ;;  %p2068_p0 = por %p2067_p12, %p2066_p10 }
  0x66   : > { %p2069_p2 = pnand %p2068_p0, %p2062_p5 }
  0x68   : > { %2072 = shalt.err (!%p2069_p2)
}
  0x69   : > { %1905 = dma.hbm_to_vmem [thread:$0]  (!%p2341_p7), %s2338_s14, 128, %s2345_s15, %s394_s28  }
  0x6a   : > { %s411_s7 = sand.u32 1, %s2149_s24   ;;  %s415_s19 = scalar_lea.vmem [#allocation4], %s2332_s20 }
  0x6b   : > { %s422_s12 = sshll.u32 %s415_s19, 4  ;;  %s412_s17 = scalar_lea.sflag [#allocation5], %s411_s7  ;;  %s423_s12 = int_to_ptr.vmem [resolvable:$true] %s422_s12 }
  0x6c   : > { %s2073_s29 = scalar_lea.hbm %s2350_s30, 128  ;;  %s2078_s5 = scalar_lea.hbm %s2575_s1, 256 }
  0x6d   : > { %p2074_p13 = scmp.ne.s32.totalorder %s2350_s30, %s2073_s29  ;;  %p2079_p9 = scmp.lt.u32.totalorder %s2350_s30, %s2575_s1 }
  0x6e   : > { %p2080_p8 = scmp.lt.u32.totalorder %s2078_s5, %s2073_s29  ;;  %p2082_p4 = scmp.lt.u32.totalorder %s2073_s29, %s2350_s30 }
  0x6f   : > { %p2076_p3 = pnand %p2074_p13, %p2045_p11 }
  0x70   : > { %p2081_p1 = por %p2080_p8, %p2079_p9 }
  0x71   : > { %p2077_p6 = pneg %p2076_p3 }
  0x72   : > { %p2083_p5 = por %p2082_p4, %p2081_p1 }
  0x74   : > { %p2084_p10 = pnand %p2083_p5, %p2077_p6 }
  0x76   : > { %2087 = shalt.err (!%p2084_p10)
}
  0x77   : > { %s2088_s24 = scalar_lea.vmem %s423_s12, 128  ;;  %s2156_s20 = smov [#allocation4]  }
  0x78   : > { %p2089_p12 = scmp.ne.s32.totalorder %s423_s12, %s2088_s24  ;;  %s2093_s14 = sshll.u32 %s2156_s20, 4  ;;  %s2094_s14 = int_to_ptr.vmem [resolvable:$false] %s2093_s14 }
  0x79   : > { %s2095_s15 = scalar_lea.vmem %s2094_s14, 256  ;;  %p2096_p13 = scmp.lt.s32.totalorder %s423_s12, %s2094_s14 }
  0x7a   : > { %p2091_p0 = pnand %p2089_p12, %p2045_p11  ;;  %p2097_p3 = scmp.lt.s32.totalorder %s2095_s15, %s2088_s24 }
  0x7c   : > { %p2092_p2 = pneg %p2091_p0  ;;  %p2098_p8 = por %p2097_p3, %p2096_p13 }
  0x7e   : > { %p2099_p9 = pnand %p2098_p8, %p2092_p2 }
  0x80   : > { %2102 = shalt.err (!%p2099_p9)
}
  0x81   : > { %1908 = dma.hbm_to_vmem [thread:$0]  (!%p2341_p7), %s2350_s30, 128, %s423_s12, %s412_s17  }
  0x82   : > { %p2603_p6 = scmp.ne.s32.totalorder %s2597_s27, 0 }
  0x83   : > { %s469_s28 = sand.u32 (!%p2603_p6), 1, %s2141_s22   ;;  %p2604_p11 = scmp.ne.s32.totalorder (!%p2603_p6), %s2596_s26, 0 }
  0x84   : > { %467 = sbr.rel (%p2603_p6) target bundleno = 1699 (0x6a3), region = 68  ;;  %s1666_s7 = sshll.u32 (!%p2603_p6), %s469_s28, 3 }
  0x85   : > { %s470_s19 = scalar_lea.sflag (!%p2603_p6), [#allocation3], %s469_s28  ;;  %s473_s29 = scalar_lea.vmem (!%p2603_p6), [#allocation2], %s1666_s7 }
  0x8b   : > { %2120 = dma.done.wait (%p2604_p11), %s470_s19, 128  }
  0x8c   : > { %2122 = vsyncadd (%p2604_p11), %s470_s19, 4294967168  ;;  %s478_s13 = sand.u32 1, %s2245_s25   ;;  %s482_s18 = scalar_lea.vmem [#allocation4], %s1666_s7 }
  0x8d   : > { %s479_s11 = scalar_lea.sflag [#allocation5], %s478_s13 }
  0x8e   : > { %2124 = dma.done.wait (%p2604_p11), %s479_s11, 128  }
  0x8f   : > { %2126 = vsyncadd (%p2604_p11), %s479_s11, 4294967168  ;;  %p2605_p7 = scmp.eq.s32.totalorder %s2245_s25, 0 }
  0x91   : > { %2128 = dma.done.wait (%p2605_p7), [#allocation5], 32   ;;  %p2606_p1 = pmov %p2605_p7 }
  0x93   : > { %2130 = vsyncadd (%p2606_p1), [#allocation5], 4294967264  ;;  %p2607_p4 = pmov %p2606_p1 }
  0x94   : > { %p2608_p5 = pmov %p2606_p1 }
  0x95   : > { %2132 = dma.done.wait (%p2607_p4), [#allocation8], 32  }
  0x96   : > { %2134 = vsyncadd (%p2608_p5), [#allocation8], 4294967264  ;;  %v2157_v0 = vmov 0.0   ;;  %vm2158_vm0 = vmmov 0   ;;  %vm607_vm1 = vcmask 1045504   ;;  %v587_v2 = vld [vmem:[%s473_s29] sm:$0xff]  ;;  %v942_v53 = vlaneseq }
  0x97   : > { %1781 = vmatprep.subr.bf16.mxu0 %v2157_v0  ;;  %1783 = vmatprep.mubr.msk.bf16.mxu0 %vm2158_vm0, %v2157_v0  ;;  %v1954_v1 = vld [vmem:[%s2576_s2] sm:$0x3f]   ;;  %v651_v3 = vld [vmem:[%s482_s18] sm:$0xff]  ;;  %v588_v5 = vpack.c.bf16 %v587_v2, %v587_v2  ;;  %vm603_vm2 = vcmask 97280   ;;  %s2159_s30 = smov 8   ;;  %v1956_v7 = vld [vmem:[%s2578_s4 + $0x8] sm:$0xff]  }
  0x98   : > { %1787 = vmatprep.subr.bf16.mxu1 %v2157_v0  ;;  %1791 = vmatprep.mubr.msk.bf16.mxu1 %vm2158_vm0, %v2157_v0  ;;  %v609_v4 = vsel %vm607_vm1, %v1954_v1, 0  ;;  %v1955_v6 = vld [vmem:[%s2578_s4] sm:$0xff]   ;;  %vm656_vm3 = vcmask 64512   ;;  %vm682_vm4 = vcmask 261120   ;;  %v1958_v18 = vld [vmem:[%s2580_s6 + $0x8] sm:$0xff]   ;;  %v1959_v19 = vld [vmem:[%s2578_s4 + $0x10] sm:$0xff]  }
  0x99   : > { %653 = vrot.lane.b32.xlu0 %v651_v3, %s2159_s30  ;;  %1782 = vmatpush3.bf16.msra.mxu0 %v609_v4  ;;  %v1957_v8 = vld [vmem:[%s2580_s6] sm:$0xff]   ;;  %v1960_v28 = vld [vmem:[%s2578_s4 + $0x18] sm:$0xff]   ;;  %v1961_v29 = vld [vmem:[%s2580_s6 + $0x10] sm:$0xff]   ;;  %s1670_s30 = sshll.u32 %s2245_s25, 2  ;;  %v2160_v51 = vmov 1983009808  }
  0x9a   : > { %1788 = vmatpush3.bf16.msra.mxu1 %v1955_v6  ;;  %1795 = vmatprep.subr.bf16.mxu0 %v2157_v0  ;;  %v1680_v9 = vld [vmem:[%s2577_s3] ss:$0 sm:$0xff]  ;;  %v1690_v31 = vld [vmem:[#allocation7] ss:$0 sm:$0xff]  ;;  %v1962_v38 = vld [vmem:[%s2580_s6 + $0x18] sm:$0xff]   ;;  %p557_p10 = scmp.lt.s32.totalorder %s1670_s30, 7  ;;  %v940_v52 = vunpack.c.l.s4 %v2160_v51 }
  0x9b   : > { %1789 = vmatprep.subr.bf16.mxu1 %v2157_v0  ;;  %v1683_v20 = vld [vmem:[#allocation6] ss:$0 sm:$0xff]  ;;  %v1695_v39 = vld [vmem:[#allocation6 + $0x1] ss:$0 sm:$0xff]  ;;  %v943_v55 = vshrl.u32 %v942_v53, 7  ;;  %s2609_s19 = sld [smem:[#allocation17_spill]] }
  0x9c   : > { %1784 = vmatmul.mubr.msk.bf16.vlgmr.msra.gmra.mrb[0].mxu0 %vm603_vm2, %v588_v5  ;;  %s2617_s30 = smov (!%p557_p10, %s1670_s30), 7  ;;  %v941_v54 = vunpack.c.0.s8 %v940_v52  ;;  %v1706_v57 = vld [vmem:[#allocation7 + $0x1] ss:$0 sm:$0xff]  ;;  %s2610_s26 = sld [smem:[#allocation18_spill]]  ;;  %vm1499_vm5 = vcmask 25600  }
  0x9d   : > { %1799 = vmatprep.mubr.msk.bf16.mxu0 %vm2158_vm0, %v2157_v0  ;;  %1796 = vmatpush3.bf16.msra.mxu0 %v1957_v8  ;;  %s1741_s12 = sshll.u32 %s2617_s30, 4  ;;  %s566_s15 = scalar_lea.vmem %s2583_s9, %s2617_s30 }
  0x9e   : > { %1790 = vmatpush3.bf16.msra.mxu1 %v1956_v7  ;;  %1797 = vmatprep.subr.bf16.mxu0 %v2157_v0  ;;  %s2486_s21 = scalar_lea.vmem %s2582_s8, %s1741_s12  ;;  %v944_v59 = vsub.s32 %v941_v54, %v943_v55  ;;  %s2521_s24 = scalar_lea.vmem %s2584_s10, %s1741_s12 }
  0x9f   : > { %1803 = vmatprep.subr.bf16.mxu1 %v2157_v0  ;;  %v1963_v47 = vld [vmem:[%s2486_s21] sm:$0xff]   ;;  %v1964_v48 = vld [vmem:[%s2486_s21 + $0x10] sm:$0xff]   ;;  %v1965_v49 = vld [vmem:[%s2486_s21 + $0x8] sm:$0xff]   ;;  %s1679_s13 = sshll.u32 %s2617_s30, 1 }
  0xa0   : > { %v1966_v50 = vld [vmem:[%s2486_s21 + $0x18] sm:$0xff]   ;;  %v1967_v3 = vld [vmem:[%s2486_s21 + $0x20] sm:$0xff]   ;;  %v1968_v6 = vld [vmem:[%s2486_s21 + $0x30] sm:$0xff]  }
  0xa1   : > { %1798 = vmatpush3.bf16.msra.mxu0 %v1958_v18  ;;  %v1707_v18 = vld [vmem:[%s566_s15] ss:$0 sm:$0xff]  ;;  %s578_s29 = scalar_lea.vmem %s2609_s19, %s2617_s30 }
  0xa2   : > { %1811 = vmatprep.subr.bf16.mxu0 %v2157_v0  ;;  %v1723_v54 = vld [vmem:[%s578_s29] ss:$0 sm:$0xff]  ;;  %s584_s27 = scalar_lea.vmem %s2610_s26, %s1679_s13  ;;  %v1724_v55 = vld [vmem:[%s578_s29 + $0x1] ss:$0 sm:$0xff] }
 0x10b   : > { %v654_v11 = vpop.permute.xlu0 %653 }
 0x16f   : > { %v645_v10 = vpop.f32.mrb[0].mxu0 }
 0x170   : > { %v646_v12 = vadd.f32 %v1680_v9, %v645_v10  ;;  %v1785_v13 = vpop.f32.mrb[1].mxu0  ;;  %v1969_v9 = vld [vmem:[%s2486_s21 + $0x28] sm:$0xff]   ;;  %v1970_v10 = vld [vmem:[%s2486_s21 + $0x38] sm:$0xff]  }
 0x171   : > { %v648_v14 = vpop.f32.mrb[2].mxu0 }
 0x172   : > { %v657_v15 = vsel %vm656_vm3, %v646_v12, %v654_v11  ;;  %v1786_v16 = vpop.f32.mrb[3].mxu0  ;;  %v1971_v14 = vld [vmem:[%s2521_s24] sm:$0xff]  }
 0x173   : > { %v658_v17 = vpack.c.bf16 %v657_v15, %v657_v15  ;;  %v1973_v16 = vld [vmem:[%s2521_s24 + $0x8] sm:$0xff]  }
 0x175   : > { %1792 = vmatmul.mubr.msk.bf16.vlgmr.msra.gmra.mrb[0].mxu1 %vm682_vm4, %v658_v17  ;;  %v1974_v17 = vld [vmem:[%s2521_s24 + $0x18] sm:$0xff]  }
 0x176   : > { %1807 = vmatprep.mubr.msk.bf16.mxu1 %vm2158_vm0, %v2157_v0  ;;  %1804 = vmatpush3.bf16.msra.mxu1 %v1959_v19 }
 0x177   : > { %1805 = vmatprep.subr.bf16.mxu1 %v2157_v0 }
 0x17a   : > { %1806 = vmatpush3.bf16.msra.mxu1 %v1960_v28 }
 0x17b   : > { %1819 = vmatprep.subr.bf16.mxu1 %v2157_v0 }
 0x248   : > { %v720_v21 = vpop.f32.mrb[0].mxu1 }
 0x249   : > { %v721_v22 = vadd.f32 %v1683_v20, %v720_v21  ;;  %v1793_v23 = vpop.f32.mrb[1].mxu1  ;;  %v1708_v20 = vld [vmem:[%s566_s15 + $0x1] ss:$0 sm:$0xff] }
 0x24a   : > { %v723_v24 = vpop.f32.mrb[2].mxu1 }
 0x24b   : > { %v726_v25 = vmax.f32 %v721_v22, 0.0  ;;  %v1794_v26 = vpop.f32.mrb[3].mxu1 }
 0x24d   : > { %v727_v27 = vpack.c.bf16 %v726_v25, %v726_v25 }
 0x24f   : > { %1800 = vmatmul.mubr.msk.bf16.vlgmr.msra.gmra.mrb[4].mxu0 %vm682_vm4, %v727_v27 }
 0x250   : > { %1815 = vmatprep.mubr.msk.bf16.mxu0 %vm2158_vm0, %v2157_v0  ;;  %1812 = vmatpush3.bf16.msra.mxu0 %v1961_v29 }
 0x251   : > { %1813 = vmatprep.subr.bf16.mxu0 %v2157_v0 }
 0x254   : > { %1814 = vmatpush3.bf16.msra.mxu0 %v1962_v38 }
 0x255   : > { %1827 = vmatprep.subr.bf16.mxu0 %v2157_v0 }
 0x322   : > { %v781_v30 = vpop.f32.mrb[4].mxu0 }
 0x323   : > { %v787_v32 = vadd.f32 %v781_v30, %v657_v15  ;;  %v1801_v33 = vpop.f32.mrb[5].mxu0  ;;  %v1972_v15 = vld [vmem:[%s2521_s24 + $0x10] sm:$0xff]   ;;  %v1709_v30 = vld [vmem:[%s566_s15 + $0x2] ss:$0 sm:$0xff] }
 0x324   : > { %v784_v34 = vpop.f32.mrb[6].mxu0 }
 0x325   : > { %v795_v35 = vadd.f32 %v1690_v31, %v787_v32  ;;  %v1802_v36 = vpop.f32.mrb[7].mxu0  ;;  %v1710_v32 = vld [vmem:[%s566_s15 + $0x3] ss:$0 sm:$0xff] }
 0x327   : > { %v796_v37 = vpack.c.bf16 %v795_v35, %v795_v35 }
 0x329   : > { %1808 = vmatmul.mubr.msk.bf16.vlgmr.msra.gmra.mrb[4].mxu1 %vm682_vm4, %v796_v37 }
 0x32a   : > { %1823 = vmatprep.mubr.msk.bf16.mxu1 %vm2158_vm0, %v2157_v0  ;;  %1820 = vmatpush3.bf16.msra.mxu1 %v1963_v47 }
 0x32b   : > { %1821 = vmatprep.subr.bf16.mxu1 %v2157_v0 }
 0x32e   : > { %1822 = vmatpush3.bf16.msra.mxu1 %v1965_v49  ;;  %v1978_v49 = vld [vmem:[%s2521_s24 + $0x38] sm:$0xff]  }
 0x32f   : > { %1835 = vmatprep.subr.bf16.mxu1 %v2157_v0 }
 0x3fc   : > { %v859_v40 = vpop.f32.mrb[4].mxu1 }
 0x3fd   : > { %v860_v41 = vadd.f32 %v1695_v39, %v859_v40  ;;  %v1809_v42 = vpop.f32.mrb[5].mxu1 }
 0x3fe   : > { %v862_v43 = vpop.f32.mrb[6].mxu1 }
 0x3ff   : > { %v865_v44 = vmax.f32 %v860_v41, 0.0  ;;  %v1810_v45 = vpop.f32.mrb[7].mxu1  ;;  %v1975_v43 = vld [vmem:[%s2521_s24 + $0x20] sm:$0xff]  }
 0x401   : > { %v866_v46 = vpack.c.bf16 %v865_v44, %v865_v44 }
 0x403   : > { %1816 = vmatmul.mubr.msk.bf16.vlgmr.msra.gmra.mrb[8].mxu0 %vm682_vm4, %v866_v46  ;;  %v1976_v46 = vld [vmem:[%s2521_s24 + $0x30] sm:$0xff]  }
 0x404   : > { %1831 = vmatprep.mubr.msk.bf16.mxu0 %vm2158_vm0, %v2157_v0  ;;  %1828 = vmatpush3.bf16.msra.mxu0 %v1964_v48  ;;  %v1977_v48 = vld [vmem:[%s2521_s24 + $0x28] sm:$0xff]  }
 0x405   : > { %1829 = vmatprep.subr.bf16.mxu0 %v2157_v0 }
 0x408   : > { %1830 = vmatpush3.bf16.msra.mxu0 %v1966_v50 }
 0x409   : > { %1843 = vmatprep.subr.bf16.mxu0 %v2157_v0 }
 0x4d6   : > { %v921_v56 = vpop.f32.mrb[8].mxu0 }
 0x4d7   : > { %v927_v58 = vadd.f32 %v921_v56, %v795_v35  ;;  %v1817_v60 = vpop.f32.mrb[9].mxu0 }
 0x4d8   : > { %v924_v61 = vpop.f32.mrb[10].mxu0 }
 0x4d9   : > { %v936_v62 = vadd.f32 %v1706_v57, %v927_v58  ;;  %v1818_v63 = vpop.f32.mrb[11].mxu0 }
 0x4db   : > { %v938_v1 = vcombine.high %v936_v62, %v936_v62  ;;  %v945_v2 = vrot.slane %v936_v62, %v944_v59 }
 0x4dd   : > { %v953_v4 = vcombine.high %v945_v2, %v945_v2  ;;  %v959_v5 = vpack.c.bf16 %v945_v2, %v945_v2  ;;  %v952_v7 = vrot.slane %v938_v1, %v944_v59  ;;  %v1725_v2 = vld [vmem:[%s578_s29 + $0x2] ss:$0 sm:$0xff] }
 0x4df   : > { %v960_v8 = vpack.c.bf16 %v953_v4, %v953_v4  ;;  %1824 = vmatmul.mubr.msk.bf16.vlgmr.msra.gmra.mrb[8].mxu1 %vm682_vm4, %v959_v5  ;;  %v954_v11 = vcombine.high %v952_v7, %v952_v7  ;;  %v961_v12 = vpack.c.bf16 %v952_v7, %v952_v7  ;;  %v1726_v4 = vld [vmem:[%s578_s29 + $0x3] ss:$0 sm:$0xff] }
 0x4e0   : > { %1836 = vmatpush3.bf16.msra.mxu1 %v1967_v3  ;;  %1839 = vmatprep.mubr.msk.bf16.mxu1 %vm2158_vm0, %v2157_v0 }
 0x4e1   : > { %1832 = vmatmul.mubr.msk.bf16.vlgmr.msra.gmra.mrb[12].mxu0 %vm682_vm4, %v960_v8  ;;  %1837 = vmatprep.subr.bf16.mxu1 %v2157_v0  ;;  %v962_v13 = vpack.c.bf16 %v954_v11, %v954_v11 }
 0x4e2   : > { %1844 = vmatpush3.bf16.msra.mxu0 %v1968_v6  ;;  %1847 = vmatprep.mubr.msk.bf16.mxu0 %vm2158_vm0, %v2157_v0 }
 0x4e3   : > { %1845 = vmatprep.subr.bf16.mxu0 %v2157_v0 }
 0x4e4   : > { %1838 = vmatpush3.bf16.msra.mxu1 %v1969_v9 }
 0x4e5   : > { %1851 = vmatprep.subr.bf16.mxu1 %v2157_v0 }
 0x4e6   : > { %1846 = vmatpush3.bf16.msra.mxu0 %v1970_v10 }
 0x4e7   : > { %1840 = vmatmul.mubr.msk.bf16.vlgmr.msra.gmra.mrb[12].mxu1 %vm682_vm4, %v961_v12  ;;  %1859 = vmatprep.subr.bf16.mxu0 %v2157_v0 }
 0x4e8   : > { %1855 = vmatprep.mubr.msk.bf16.mxu1 %vm2158_vm0, %v2157_v0  ;;  %1852 = vmatpush3.bf16.msra.mxu1 %v1971_v14 }
 0x4e9   : > { %1848 = vmatmul.mubr.msk.bf16.vlgmr.msra.gmra.mrb[16].mxu0 %vm682_vm4, %v962_v13  ;;  %1853 = vmatprep.subr.bf16.mxu1 %v2157_v0 }
 0x4ea   : > { %1863 = vmatprep.mubr.msk.bf16.mxu0 %vm2158_vm0, %v2157_v0  ;;  %1860 = vmatpush3.bf16.msra.mxu0 %v1972_v15 }
 0x4eb   : > { %1861 = vmatprep.subr.bf16.mxu0 %v2157_v0 }
 0x4ec   : > { %1854 = vmatpush3.bf16.msra.mxu1 %v1973_v16 }
 0x4ed   : > { %1867 = vmatprep.subr.bf16.mxu1 %v2157_v0 }
 0x4ee   : > { %1862 = vmatpush3.bf16.msra.mxu0 %v1974_v17 }
 0x4ef   : > { %1875 = vmatprep.subr.bf16.mxu0 %v2157_v0 }
 0x5b2   : > { %v1056_v19 = vpop.f32.mrb[8].mxu1 }
 0x5b3   : > { %v1057_v21 = vadd.f32 %v1707_v18, %v1056_v19  ;;  %v1825_v22 = vpop.f32.mrb[9].mxu1 }
 0x5b4   : > { %v1059_v23 = vpop.f32.mrb[10].mxu1  ;;  %v1111_v24 = vpop.f32.mrb[12].mxu0 }
 0x5b5   : > { %1979 = vtanh.f32 %v1057_v21  ;;  %v1112_v25 = vadd.f32 %v1708_v20, %v1111_v24  ;;  %v1826_v26 = vpop.f32.mrb[11].mxu1  ;;  %v1833_v27 = vpop.f32.mrb[13].mxu0 }
 0x5b6   : > { %v1114_v28 = vpop.f32.mrb[14].mxu0 }
 0x5b7   : > { %1981 = vtanh.f32 %v1112_v25  ;;  %v1834_v29 = vpop.f32.mrb[15].mxu0 }
 0x5ba   : > { %v1166_v31 = vpop.f32.mrb[12].mxu1 }
 0x5bb   : > { %v1167_v33 = vadd.f32 %v1709_v30, %v1166_v31  ;;  %v1841_v34 = vpop.f32.mrb[13].mxu1 }
 0x5bc   : > { %v1169_v35 = vpop.f32.mrb[14].mxu1  ;;  %v1221_v36 = vpop.f32.mrb[16].mxu0 }
 0x5bd   : > { %1983 = vtanh.f32 %v1167_v33  ;;  %v1222_v37 = vadd.f32 %v1710_v32, %v1221_v36  ;;  %v1842_v38 = vpop.f32.mrb[15].mxu1  ;;  %v1849_v39 = vpop.f32.mrb[17].mxu0 }
 0x5be   : > { %v1224_v40 = vpop.f32.mrb[18].mxu0 }
 0x5bf   : > { %v1980_v41 = vpop.eup %1979  ;;  %1985 = vtanh.f32 %v1222_v37  ;;  %v1850_v42 = vpop.f32.mrb[19].mxu0 }
 0x5c0   : > { %v1231_v44 = vpack.c.bf16 %v1980_v41, %v1980_v41 }
 0x5c1   : > { %v1982_v45 = vpop.eup %1981 }
 0x5c2   : > { %v1232_v47 = vpack.c.bf16 %v1982_v45, %v1982_v45  ;;  %1856 = vmatmul.mubr.msk.bf16.vlgmr.msra.gmra.mrb[16].mxu1 %vm682_vm4, %v1231_v44 }
 0x5c3   : > { %1868 = vmatpush3.bf16.msra.mxu1 %v1975_v43  ;;  %1871 = vmatprep.mubr.msk.bf16.mxu1 %vm2158_vm0, %v2157_v0 }
 0x5c4   : > { %1864 = vmatmul.mubr.msk.bf16.vlgmr.msra.gmra.mrb[20].mxu0 %vm682_vm4, %v1232_v47  ;;  %1869 = vmatprep.subr.bf16.mxu1 %v2157_v0 }
 0x5c5   : > { %1876 = vmatpush3.bf16.msra.mxu0 %v1976_v46  ;;  %1879 = vmatprep.mubr.msk.bf16.mxu0 %vm2158_vm0, %v2157_v0 }
 0x5c6   : > { %1877 = vmatprep.subr.bf16.mxu0 %v2157_v0 }
 0x5c7   : > { %v1984_v50 = vpop.eup %1983  ;;  %1870 = vmatpush3.bf16.msra.mxu1 %v1977_v48 }
 0x5c8   : > { %v1233_v51 = vpack.c.bf16 %v1984_v50, %v1984_v50 }
 0x5c9   : > { %v1986_v52 = vpop.eup %1985  ;;  %1878 = vmatpush3.bf16.msra.mxu0 %v1978_v49 }
 0x5ca   : > { %v1234_v53 = vpack.c.bf16 %v1986_v52, %v1986_v52  ;;  %1872 = vmatmul.mubr.msk.bf16.vlgmr.msra.gmra.mrb[20].mxu1 %vm682_vm4, %v1233_v51 }
 0x5cc   : > { %1880 = vmatmul.mubr.msk.bf16.vlgmr.msra.gmra.mrb[24].mxu0 %vm682_vm4, %v1234_v53 }
 0x695   : > { %v1328_v0 = vpop.f32.mrb[16].mxu1 }
 0x696   : > { %v1329_v56 = vadd.f32 %v1723_v54, %v1328_v0  ;;  %v1857_v57 = vpop.f32.mrb[17].mxu1 }
 0x697   : > { %v1331_v58 = vpop.f32.mrb[18].mxu1  ;;  %v1383_v59 = vpop.f32.mrb[20].mxu0 }
 0x698   : > { %1500 = vst.msk [vmem:[%s584_s27] sm:$0x3] %vm1499_vm5, %v1329_v56  ;;  %v1384_v60 = vadd.f32 %v1724_v55, %v1383_v59  ;;  %v1858_v61 = vpop.f32.mrb[19].mxu1  ;;  %v1865_v62 = vpop.f32.mrb[21].mxu0 }
 0x699   : > { %v1386_v63 = vpop.f32.mrb[22].mxu0 }
 0x69a   : > { %1501 = vst.msk [vmem:[%s584_s27 + $0x2] sm:$0x3] %vm1499_vm5, %v1384_v60  ;;  %v1866_v1 = vpop.f32.mrb[23].mxu0 }
 0x69d   : > { %v1438_v3 = vpop.f32.mrb[20].mxu1 }
 0x69e   : > { %v1439_v5 = vadd.f32 %v1725_v2, %v1438_v3  ;;  %v1873_v6 = vpop.f32.mrb[21].mxu1 }
 0x69f   : > { %v1441_v7 = vpop.f32.mrb[22].mxu1  ;;  %v1493_v8 = vpop.f32.mrb[24].mxu0 }
 0x6a0   : > { %1502 = vst.msk [vmem:[%s584_s27 + $0x4] sm:$0x3] %vm1499_vm5, %v1439_v5  ;;  %v1494_v9 = vadd.f32 %v1726_v4, %v1493_v8  ;;  %v1874_v10 = vpop.f32.mrb[23].mxu1  ;;  %v1881_v11 = vpop.f32.mrb[25].mxu0 }
 0x6a1   : > { %v1496_v12 = vpop.f32.mrb[26].mxu0 }
 0x6a2   : > { %1503 = vst.msk [vmem:[%s584_s27 + $0x6] sm:$0x3] %vm1499_vm5, %v1494_v9  ;;  %v1882_v13 = vpop.f32.mrb[27].mxu0 }
 0x6a3 PF: > { %s2611_s30 = sld [smem:[#allocation13_spill]]  ;;  %s2612_s23 = sld [smem:[#allocation14_spill]] }
 0x6a4   : > { %p26_p12 = scmp.ge.s32.totalorder %s2319_s16, 4   ;;  %s2613_s21 = smov %s2141_s22 }
 0x6a5   : > { %s2615_s24 = smov %s2319_s16 }
 0x6a6   :  { %28 = sbr.rel (!%p26_p12) target bundleno = 11 (0xb), region = 145 }
 0x6a9   : > { %s2614_s22 = smov %s2611_s30 }
 0x6ad   :  { %1526 = vsyncpa [#allocation3], 1 }
 0x6ae   :  { %1528 = vsyncpa [#allocation3 + $0x1], 1 }
 0x6af   :  { %1529 = vsyncpa [#allocation5], 1 }
 0x6b0   :  { %1531 = vsyncpa [#allocation5 + $0x1], 1 }
 0x6b1   :  { %1532 = vsyncpa [#allocation8], 1 }

</bundles_post_ra>
